<compile_context>
chip_gen: v7x
topology: tpu7x:2x2x1
jax: 0.10.0
libtpu: 0.0.40
codegen_flags: <defaults>
</compile_context>

<pallas_src>
import functools

import jax
import jax.numpy as jnp
from jax.experimental import pallas as pl
from jax.experimental.pallas import tpu as pltpu


def _round_up(n, m):
    return ((n + m - 1) // m) * m


# --------------------------------- Pallas kernel --------------------------------

def _net_diffusion_kernel(segs, x_ref, w_ref, b_ref, out_ref):
    """segs: static tuple of (col_offset, k_pad, n_pad) per layer.

    x_ref   : (TB, 128)      bf16   batch tile (zero-padded input features)
    w_ref   : (K_MAX, COLS)  bf16   all 6 weights, 128-aligned column segments
    b_ref   : (TB, COLS)     f32    all 6 biases, pre-broadcast across sublanes
    out_ref : (TB, 128)      f32    padded sigmoid output
    """

    def linear(z, i):
        off, k, n = segs[i]
        acc = jnp.dot(z.astype(jnp.bfloat16), w_ref[0:k, off:off + n],
                      preferred_element_type=jnp.float32)
        return acc + b_ref[:, off:off + n]

    z = x_ref[...]                                    # (TB, 128) bf16
    for i in range(5):                                # hid1..hid4, hid5+bn4 folded
        z = jnp.maximum(linear(z, i), 0.0)
    logits = linear(z, 5)                             # oupt (padded to 128 lanes)
    # sigmoid: exp on the EUP, divide via approx reciprocal (off the VALU)
    out_ref[...] = pl.reciprocal(1.0 + jnp.exp(-logits), approx=True)


# ----------------------------- one-time param packing ----------------------------

def pack_params(raw, tile_batch=8):
    """Pre-transpose weights to (in, out), fold eval-mode bn4 into hid5, zero-pad
    every dim to a multiple of 128, coalesce weights into one bf16 slab and biases
    into one pre-broadcast f32 slab. Call once."""
    eps = 1e-5
    s = raw["bn4_gamma"] / jnp.sqrt(raw["bn4_var"] + eps)
    t = raw["bn4_beta"] - raw["bn4_mean"] * s

    w5 = raw["w5"].T * s[None, :]                     # fold BN scale into columns
    b5 = raw["b5"] * s + t                            # fold BN shift into bias

    weights = [raw["w1"].T, raw["w2"].T, raw["w3"].T, raw["w4"].T, w5, raw["w6"].T]
    biases = [raw["b1"], raw["b2"], raw["b3"], raw["b4"], b5, raw["b6"]]

    tb = _round_up(max(int(tile_batch), 8), 8)        # sublane-aligned batch tile

    segs, off, k_max = [], 0, 0
    for w in weights:
        k, n = int(w.shape[0]), int(w.shape[1])
        kp, npad = _round_up(k, 128), _round_up(n, 128)
        segs.append((off, kp, npad, k, n))
        off += npad                                   # next segment 128-aligned
        k_max = max(k_max, kp)
    total_cols = off

    w_slab = jnp.zeros((k_max, total_cols), jnp.float32)
    b_slab = jnp.zeros((1, total_cols), jnp.float32)
    for (o, _, _, k, n), w, b in zip(segs, weights, biases):
        w_slab = w_slab.at[:k, o:o + n].set(w.astype(jnp.float32))
        b_slab = b_slab.at[0, o:o + n].set(b.astype(jnp.float32))

    return {
        "w_slab": w_slab.astype(jnp.bfloat16),                       # one-time cast
        "b_slab": jnp.tile(b_slab, (tb, 1)).astype(jnp.float32),     # pre-broadcast
        "segs": tuple((o, kp, npad) for (o, kp, npad, _, _) in segs),
        "tile_batch": tb,
        "in_dim": int(raw["w1"].shape[1]),
        "in_dim_pad": _round_up(int(raw["w1"].shape[1]), 128),
        "out_dim": int(raw["w6"].shape[0]),
        "out_dim_pad": _round_up(int(raw["w6"].shape[0]), 128),
    }


# ------------------------------------ wrapper ------------------------------------

def net_diffusion_forward(x, packed):
    tb = packed["tile_batch"]
    d_in, d_in_pad = packed["in_dim"], packed["in_dim_pad"]
    d_out, d_out_pad = packed["out_dim"], packed["out_dim_pad"]
    w_slab, b_slab, segs = packed["w_slab"], packed["b_slab"], packed["segs"]
    k_max, cols = w_slab.shape

    batch = x.shape[0]
    b_pad = _round_up(batch, tb)

    # Zero-pad input to (b_pad, 128) bf16 (zero rows/cols are exact under the
    # relu chain and are sliced off after the call).
    xp = jnp.zeros((b_pad, d_in_pad), jnp.bfloat16)
    xp = xp.at[:batch, :d_in].set(x.astype(jnp.bfloat16))

    kernel = functools.partial(_net_diffusion_kernel, segs)

    flops = 2 * b_pad * sum(kp * npad for (_, kp, npad) in segs)
    bytes_accessed = (2 * xp.size + 2 * w_slab.size + 4 * b_slab.size
                      + 4 * b_pad * d_out_pad)
    cost = pl.CostEstimate(flops=flops,
                           transcendentals=b_pad * d_out_pad,
                           bytes_accessed=bytes_accessed)

    out = pl.pallas_call(
        kernel,
        out_shape=jax.ShapeDtypeStruct((b_pad, d_out_pad), jnp.float32),
        grid=(b_pad // tb,),
        in_specs=[
            pl.BlockSpec((tb, d_in_pad), lambda i: (i, 0)),     # batch tile
            pl.BlockSpec((k_max, cols), lambda i: (0, 0)),      # weights: resident
            pl.BlockSpec((tb, cols), lambda i: (0, 0)),         # biases:  resident
        ],
        out_specs=pl.BlockSpec((tb, d_out_pad), lambda i: (i, 0)),
        cost_estimate=cost,
        compiler_params=pltpu.CompilerParams(
            dimension_semantics=("parallel",),                  # v7x: 2 TCs
            vmem_limit_bytes=32 << 20),
    )(xp, w_slab, b_slab)

    return out[:batch, :d_out]


# ------------------------------ parameter creation -------------------------------

def init_params(key, inp_size, out_size, hidden):
    # dims of the 6 Linear layers: in -> 6h -> 4h -> 3h -> 5h -> 8h -> out
    dims = [inp_size, 6 * hidden, 4 * hidden, 3 * hidden, 5 * hidden, 8 * hidden,
            out_size]
    keys = jax.random.split(key, 6)
    raw = {}
    for i in range(6):
        fan_in, fan_out = dims[i], dims[i + 1]
        if i < 5:   # kaiming_uniform_ (gain sqrt(2) -> bound sqrt(6/fan_in))
            bound = (6.0 / fan_in) ** 0.5
        else:       # xavier_uniform_ for oupt
            bound = (6.0 / (fan_in + fan_out)) ** 0.5
        raw[f"w{i+1}"] = jax.random.uniform(keys[i], (fan_out, fan_in),
                                            jnp.float32, -bound, bound)
        raw[f"b{i+1}"] = jnp.zeros((fan_out,), jnp.float32)
    # bn4 parameters / running stats (PyTorch default init)
    raw["bn4_gamma"] = jnp.ones((8 * hidden,), jnp.float32)
    raw["bn4_beta"] = jnp.zeros((8 * hidden,), jnp.float32)
    raw["bn4_mean"] = jnp.zeros((8 * hidden,), jnp.float32)
    raw["bn4_var"] = jnp.ones((8 * hidden,), jnp.float32)
    return raw


def reference_forward(x, raw):
    """Pure-JAX f32 reference (eval-mode BN), for correctness validation."""
    relu = lambda v: jnp.maximum(v, 0.0)
    z = relu(x @ raw["w1"].T + raw["b1"])
    z = relu(z @ raw["w2"].T + raw["b2"])
    z = relu(z @ raw["w3"].T + raw["b3"])
    z = relu(z @ raw["w4"].T + raw["b4"])
    y = z @ raw["w5"].T + raw["b5"]
    eps = 1e-5
    y = (y - raw["bn4_mean"]) / jnp.sqrt(raw["bn4_var"] + eps) * raw["bn4_gamma"] \
        + raw["bn4_beta"]
    z = relu(y)
    logits = z @ raw["w6"].T + raw["b6"]
    return 1.0 / (1.0 + jnp.exp(-logits))


# ------------------------------------- main --------------------------------------

if __name__ == "__main__":
    # Small config consistent with the module:
    #   diffusion_inp_size=16, output (config.input_size)=8, hidden_size=32, batch=8
    diffusion_inp_size = 16
    output_size = 8
    hidden_size = 32
    batch = 8

    key = jax.random.PRNGKey(0)
    k_x, k_p = jax.random.split(key)
    x = jax.random.normal(k_x, (batch, diffusion_inp_size), jnp.float32)

    raw = init_params(k_p, diffusion_inp_size, output_size, hidden_size)
    # One-time: transpose, fold BN, pad to 128-lane segments, bf16 weight slab,
    # pre-broadcast bias slab. tile_batch=8 matches the tiny demo batch; use
    # 128-512 for large batches / fused diffusion timesteps.
    packed = pack_params(raw, tile_batch=8)

    out = net_diffusion_forward(x, packed)
    jax.block_until_ready(out)

    assert out.shape == (batch, output_size)
    assert bool(jnp.all(jnp.isfinite(out)))
    ref = reference_forward(x, raw)
    # bf16 weights + approx reciprocal -> compare with a tolerance appropriate to
    # the deliberate precision choice.
    assert bool(jnp.allclose(out, ref, rtol=5e-2, atol=3e-2)), "mismatch vs reference"
    print("KERNEL_OK")
</pallas_src>

<mosaic_0001>
module attributes {stable_mosaic.version = 11 : i64} {
  func.func @_net_diffusion_kernel(%arg0: i32, %arg1: memref<8x128xbf16, #tpu.memory_space<vmem>>, %arg2: memref<256x1152xbf16, #tpu.memory_space<vmem>>, %arg3: memref<8x1152xf32, #tpu.memory_space<vmem>>, %arg4: memref<8x128xf32, #tpu.memory_space<vmem>>) attributes {dimension_semantics = [#tpu.dimension_semantics<parallel>], iteration_bounds = array<i64: 1>, scalar_prefetch = 0 : i64, scratch_operands = 0 : i64, tpu.core_type = #tpu.core_type<tc>, window_params = [{transform_indices = @transform_0, window_bounds = array<i64: 8, 128>}, {pipeline_mode = #tpu.pipeline_mode<synchronous>, transform_indices = @transform_1, window_bounds = array<i64: 256, 1152>}, {pipeline_mode = #tpu.pipeline_mode<synchronous>, transform_indices = @transform_2, window_bounds = array<i64: 8, 1152>}, {transform_indices = @transform_3, window_bounds = array<i64: 8, 128>}]} {
    %c0 = arith.constant 0 : index
    %c0_0 = arith.constant 0 : index
    %0 = vector.load %arg1[%c0, %c0_0] : memref<8x128xbf16, #tpu.memory_space<vmem>>, vector<8x128xbf16>
    %c0_1 = arith.constant 0 : index
    %c0_2 = arith.constant 0 : index
    %1 = vector.load %arg2[%c0_1, %c0_2] : memref<256x1152xbf16, #tpu.memory_space<vmem>>, vector<128x256xbf16>
    %cst = arith.constant dense<0.000000e+00> : vector<8x256xf32>
    %2 = tpu.matmul %0, %1, %cst {dimension_numbers = #tpu.dot_dimension_numbers<[1], [0], [0], [1], [0, 0, 1, 1], [], []>} : vector<8x128xbf16>, vector<128x256xbf16>, vector<8x256xf32> -> vector<8x256xf32>
    %c0_3 = arith.constant 0 : index
    %c0_4 = arith.constant 0 : index
    %3 = vector.load %arg3[%c0_3, %c0_4] : memref<8x1152xf32, #tpu.memory_space<vmem>>, vector<8x256xf32>
    %4 = arith.addf %2, %3 : vector<8x256xf32>
    %cst_5 = arith.constant 0.000000e+00 : f32
    %5 = vector.broadcast %cst_5 : f32 to vector<8x256xf32>
    %6 = arith.maximumf %4, %5 : vector<8x256xf32>
    %7 = arith.truncf %6 : vector<8x256xf32> to vector<8x256xbf16>
    %c0_6 = arith.constant 0 : index
    %c256 = arith.constant 256 : index
    %8 = vector.load %arg2[%c0_6, %c256] : memref<256x1152xbf16, #tpu.memory_space<vmem>>, vector<256x128xbf16>
    %cst_7 = arith.constant dense<0.000000e+00> : vector<8x128xf32>
    %9 = tpu.matmul %7, %8, %cst_7 {dimension_numbers = #tpu.dot_dimension_numbers<[1], [0], [0], [1], [0, 0, 1, 1], [], []>} : vector<8x256xbf16>, vector<256x128xbf16>, vector<8x128xf32> -> vector<8x128xf32>
    %c0_8 = arith.constant 0 : index
    %c256_9 = arith.constant 256 : index
    %10 = vector.load %arg3[%c0_8, %c256_9] : memref<8x1152xf32, #tpu.memory_space<vmem>>, vector<8x128xf32>
    %11 = arith.addf %9, %10 : vector<8x128xf32>
    %cst_10 = arith.constant 0.000000e+00 : f32
    %12 = vector.broadcast %cst_10 : f32 to vector<8x128xf32>
    %13 = arith.maximumf %11, %12 : vector<8x128xf32>
    %14 = arith.truncf %13 : vector<8x128xf32> to vector<8x128xbf16>
    %c0_11 = arith.constant 0 : index
    %c384 = arith.constant 384 : index
    %15 = vector.load %arg2[%c0_11, %c384] : memref<256x1152xbf16, #tpu.memory_space<vmem>>, vector<128x128xbf16>
    %cst_12 = arith.constant dense<0.000000e+00> : vector<8x128xf32>
    %16 = tpu.matmul %14, %15, %cst_12 {dimension_numbers = #tpu.dot_dimension_numbers<[1], [0], [0], [1], [0, 0, 1, 1], [], []>} : vector<8x128xbf16>, vector<128x128xbf16>, vector<8x128xf32> -> vector<8x128xf32>
    %c0_13 = arith.constant 0 : index
    %c384_14 = arith.constant 384 : index
    %17 = vector.load %arg3[%c0_13, %c384_14] : memref<8x1152xf32, #tpu.memory_space<vmem>>, vector<8x128xf32>
    %18 = arith.addf %16, %17 : vector<8x128xf32>
    %cst_15 = arith.constant 0.000000e+00 : f32
    %19 = vector.broadcast %cst_15 : f32 to vector<8x128xf32>
    %20 = arith.maximumf %18, %19 : vector<8x128xf32>
    %21 = arith.truncf %20 : vector<8x128xf32> to vector<8x128xbf16>
    %c0_16 = arith.constant 0 : index
    %c512 = arith.constant 512 : index
    %22 = vector.load %arg2[%c0_16, %c512] : memref<256x1152xbf16, #tpu.memory_space<vmem>>, vector<128x256xbf16>
    %cst_17 = arith.constant dense<0.000000e+00> : vector<8x256xf32>
    %23 = tpu.matmul %21, %22, %cst_17 {dimension_numbers = #tpu.dot_dimension_numbers<[1], [0], [0], [1], [0, 0, 1, 1], [], []>} : vector<8x128xbf16>, vector<128x256xbf16>, vector<8x256xf32> -> vector<8x256xf32>
    %c0_18 = arith.constant 0 : index
    %c512_19 = arith.constant 512 : index
    %24 = vector.load %arg3[%c0_18, %c512_19] : memref<8x1152xf32, #tpu.memory_space<vmem>>, vector<8x256xf32>
    %25 = arith.addf %23, %24 : vector<8x256xf32>
    %cst_20 = arith.constant 0.000000e+00 : f32
    %26 = vector.broadcast %cst_20 : f32 to vector<8x256xf32>
    %27 = arith.maximumf %25, %26 : vector<8x256xf32>
    %28 = arith.truncf %27 : vector<8x256xf32> to vector<8x256xbf16>
    %c0_21 = arith.constant 0 : index
    %c768 = arith.constant 768 : index
    %29 = vector.load %arg2[%c0_21, %c768] : memref<256x1152xbf16, #tpu.memory_space<vmem>>, vector<256x256xbf16>
    %cst_22 = arith.constant dense<0.000000e+00> : vector<8x256xf32>
    %30 = tpu.matmul %28, %29, %cst_22 {dimension_numbers = #tpu.dot_dimension_numbers<[1], [0], [0], [1], [0, 0, 1, 1], [], []>} : vector<8x256xbf16>, vector<256x256xbf16>, vector<8x256xf32> -> vector<8x256xf32>
    %c0_23 = arith.constant 0 : index
    %c768_24 = arith.constant 768 : index
    %31 = vector.load %arg3[%c0_23, %c768_24] : memref<8x1152xf32, #tpu.memory_space<vmem>>, vector<8x256xf32>
    %32 = arith.addf %30, %31 : vector<8x256xf32>
    %cst_25 = arith.constant 0.000000e+00 : f32
    %33 = vector.broadcast %cst_25 : f32 to vector<8x256xf32>
    %34 = arith.maximumf %32, %33 : vector<8x256xf32>
    %35 = arith.truncf %34 : vector<8x256xf32> to vector<8x256xbf16>
    %c0_26 = arith.constant 0 : index
    %c1024 = arith.constant 1024 : index
    %36 = vector.load %arg2[%c0_26, %c1024] : memref<256x1152xbf16, #tpu.memory_space<vmem>>, vector<256x128xbf16>
    %cst_27 = arith.constant dense<0.000000e+00> : vector<8x128xf32>
    %37 = tpu.matmul %35, %36, %cst_27 {dimension_numbers = #tpu.dot_dimension_numbers<[1], [0], [0], [1], [0, 0, 1, 1], [], []>} : vector<8x256xbf16>, vector<256x128xbf16>, vector<8x128xf32> -> vector<8x128xf32>
    %c0_28 = arith.constant 0 : index
    %c1024_29 = arith.constant 1024 : index
    %38 = vector.load %arg3[%c0_28, %c1024_29] : memref<8x1152xf32, #tpu.memory_space<vmem>>, vector<8x128xf32>
    %39 = arith.addf %37, %38 : vector<8x128xf32>
    %cst_30 = arith.constant 0.000000e+00 : f32
    %40 = vector.broadcast %cst_30 : f32 to vector<8x128xf32>
    %41 = arith.subf %40, %39 : vector<8x128xf32>
    %42 = math.exp %41 : vector<8x128xf32>
    %cst_31 = arith.constant 1.000000e+00 : f32
    %43 = vector.broadcast %cst_31 : f32 to vector<8x128xf32>
    %44 = arith.addf %43, %42 : vector<8x128xf32>
    %45 = tpu.reciprocal %44 {approx = true} : vector<8x128xf32> -> vector<8x128xf32>
    %c0_32 = arith.constant 0 : index
    %c0_33 = arith.constant 0 : index
    %46 = vector.load %arg4[%c0_32, %c0_33] : memref<8x128xf32, #tpu.memory_space<vmem>>, vector<8x128xf32>
    tpu.vector_store %arg4[%c0_32, %c0_33], %45 {strides = array<i32>} : memref<8x128xf32, #tpu.memory_space<vmem>>, vector<8x128xf32>,
    return
  }
  func.func @transform_0(%arg0: i32) -> (i32, i32) {
    %c0_i32 = arith.constant 0 : i32
    %c0_i32_0 = arith.constant 0 : i32
    return %arg0, %c0_i32 : i32, i32
  }
  func.func @transform_1(%arg0: i32) -> (i32, i32) {
    %c0_i32 = arith.constant 0 : i32
    %c0_i32_0 = arith.constant 0 : i32
    %c0_i32_1 = arith.constant 0 : i32
    return %c0_i32, %c0_i32_0 : i32, i32
  }
  func.func @transform_2(%arg0: i32) -> (i32, i32) {
    %c0_i32 = arith.constant 0 : i32
    %c0_i32_0 = arith.constant 0 : i32
    %c0_i32_1 = arith.constant 0 : i32
    return %c0_i32, %c0_i32_0 : i32, i32
  }
  func.func @transform_3(%arg0: i32) -> (i32, i32) {
    %c0_i32 = arith.constant 0 : i32
    %c0_i32_0 = arith.constant 0 : i32
    return %arg0, %c0_i32 : i32, i32
  }
}

</mosaic_0001>

<bundles_post_ra>
// kernel: tpu_custom_call.1
= control target key start
LH: loop header
LB: loop body
LE: loop exit
PB: predicated region body
PF: predicated region fallthrough
CT: control target
= control target key end

     0   :  { %8 = vsyncpa [#allocation3], 0  ;;  %s1547_s0 = inlined_call_operand.hbm [shape: bf16[8,128], index: 0, kind: input, shape index: {}]   ;;  %s1548_s1 = inlined_call_operand.hbm [shape: bf16[256,1152], index: 1, kind: input, shape index: {}]   ;;  %s1549_s2 = inlined_call_operand.hbm [shape: f32[8,1152], index: 2, kind: input, shape index: {}]   ;;  %s1550_s3 = inlined_call_operand.hbm [shape: f32[8,128], index: 3, kind: output, shape index: {}]  }
   0x1   :  { %9 = vsyncpa [#allocation6], 0 }
   0x2   :  { %10 = vsyncpa [#allocation4], 0  ;;  %s1468_s12 = smov [#allocation5]   ;;  %s1374_s16 = scalar_lea.hbm %s1548_s1, 18432 }
   0x3   :  { %s26_s13 = sshll.u32 %s1468_s12, 4  ;;  %p1375_p0 = scmp.ne.s32.totalorder %s1548_s1, %s1374_s16  ;;  %s27_s13 = int_to_ptr.vmem [resolvable:$true] %s26_s13 }
   0x4   :  { %p1378_p1 = scmp.lt.u32.totalorder %s1374_s16, %s1548_s1 }
   0x6   :  { %p1380_p2 = pnand %p1378_p1, %p1375_p0 }
   0x8   :  { %1383 = shalt.err (!%p1380_p2)
}
   0x9   :  { %s1384_s21 = scalar_lea.vmem %s27_s13, 18432  ;;  %p1389_p4 = scmp.lt.s32.totalorder %s27_s13, %s27_s13 }
   0xa   :  { %p1385_p3 = scmp.ne.s32.totalorder %s27_s13, %s1384_s21  ;;  %p1390_p5 = scmp.lt.s32.totalorder %s1384_s21, %s1384_s21 }
   0xc   :  { %p1391_p6 = por %p1390_p5, %p1389_p4 }
   0xe   :  { %p1392_p7 = pnand %p1391_p6, %p1385_p3 }
  0x10   :  { %1395 = shalt.err (!%p1392_p7)
}
  0x11   :  { %s1469_s22 = smov 576   ;;  %s1470_s23 = smov 36  }
  0x12   :  { %32 = dma.hbm_to_vmem [thread:$0]  %s1548_s1, 18432, %s27_s13, [#allocation6], %s1469_s22, %s1469_s22, %s1470_s23  }
  0x13   :  { %s1471_s26 = smov [#allocation2]   ;;  %s1472_s28 = smov [#allocation7]  }
  0x14   :  { %s17_s27 = sshll.u32 %s1471_s26, 4  ;;  %s39_s29 = sshll.u32 %s1472_s28, 4  ;;  %s18_s27 = int_to_ptr.vmem [resolvable:$true] %s17_s27  ;;  %s40_s29 = int_to_ptr.vmem [resolvable:$true] %s39_s29 }
  0x15   :  { %s1396_s5 = scalar_lea.hbm %s1547_s0, 64 }
  0x16   :  { %p1397_p8 = scmp.ne.s32.totalorder %s1547_s0, %s1396_s5  ;;  %p1400_p9 = scmp.lt.u32.totalorder %s1396_s5, %s1547_s0 }
  0x18   :  { %p1402_p10 = pnand %p1400_p9, %p1397_p8 }
  0x1a   :  { %1405 = shalt.err (!%p1402_p10)
}
  0x1b   :  { %s1406_s1 = scalar_lea.vmem %s18_s27, 64  ;;  %p1411_p12 = scmp.lt.s32.totalorder %s18_s27, %s18_s27 }
  0x1c   :  { %p1407_p11 = scmp.ne.s32.totalorder %s18_s27, %s1406_s1  ;;  %p1412_p13 = scmp.lt.s32.totalorder %s1406_s1, %s1406_s1 }
  0x1e   :  { %p1413_p0 = por %p1412_p13, %p1411_p12 }
  0x20   :  { %p1414_p1 = pnand %p1413_p0, %p1407_p11 }
  0x22   :  { %1417 = shalt.err (!%p1414_p1)
}
  0x23   :  { %20 = dma.hbm_to_vmem [thread:$0]  %s1547_s0, 64, %s18_s27, [#allocation3]  }
  0x24   :  { %s1418_s14 = scalar_lea.hbm %s1549_s2, 1152 }
  0x25   :  { %p1419_p2 = scmp.ne.s32.totalorder %s1549_s2, %s1418_s14  ;;  %p1422_p3 = scmp.lt.u32.totalorder %s1418_s14, %s1549_s2 }
  0x27   :  { %p1424_p4 = pnand %p1422_p3, %p1419_p2 }
  0x29   :  { %1427 = shalt.err (!%p1424_p4)
}
  0x2a   :  { %s1428_s19 = scalar_lea.vmem %s40_s29, 1152  ;;  %p1433_p6 = scmp.lt.s32.totalorder %s40_s29, %s40_s29 }
  0x2b   :  { %p1429_p5 = scmp.ne.s32.totalorder %s40_s29, %s1428_s19  ;;  %p1434_p7 = scmp.lt.s32.totalorder %s1428_s19, %s1428_s19 }
  0x2d   :  { %p1435_p8 = por %p1434_p7, %p1433_p6 }
  0x2f   :  { %p1436_p9 = pnand %p1435_p8, %p1429_p5 }
  0x31   :  { %1439 = shalt.err (!%p1436_p9)
}
  0x32   :  { %42 = dma.hbm_to_vmem [thread:$0]  %s1549_s2, 1152, %s40_s29, [#allocation6]  }
  0x33   :  { %1462 = dma.done.wait [#allocation3], 64  }
  0x34   :  { %1463 = vsyncadd [#allocation3], 4294967232 }
  0x35   :  { %1464 = dma.done.wait [#allocation6], 19584  }
  0x36   :  { %1465 = vsyncadd [#allocation6], 4294947712  ;;  %v1473_v0 = vmov 0   ;;  %v1234_v1 = vld [vmem:[#allocation5 + $0x4] ss:$36 sps:$4 sm:$0xff]   ;;  %v1474_v35 = vmov 0.0  }
  0x37   :  { %184 = vmatprep.mubr.bf16.mxu0 %v1473_v0  ;;  %v1236_v2 = vld [vmem:[#allocation5] ss:$36 sps:$4 sm:$0xff]   ;;  %152 = vmatprep.subr.bf16.mxu0 %v1234_v1  ;;  %v1237_v3 = vld [vmem:[#allocation5 + $0x4c] ss:$36 sps:$4 sm:$0xff]   ;;  %v1240_v5 = vld [vmem:[#allocation5 + $0x94] ss:$36 sps:$4 sm:$0xff]  }
  0x38   :  { %153 = vmatpush1.bf16.msra.mxu0 %v1236_v2  ;;  %v1239_v4 = vld [vmem:[#allocation5 + $0x48] ss:$36 sps:$4 sm:$0xff]   ;;  %v1242_v6 = vld [vmem:[#allocation5 + $0x90] ss:$36 sps:$4 sm:$0xff]   ;;  %v1243_v7 = vld [vmem:[#allocation5 + $0xdc] ss:$36 sps:$4 sm:$0xff]  }
  0x39   :  { %154 = vmatprep.subr.bf16.mxu0 %v1237_v3  ;;  %v1245_v8 = vld [vmem:[#allocation5 + $0xd8] ss:$36 sps:$4 sm:$0xff]   ;;  %v1246_v9 = vld [vmem:[#allocation5 + $0x124] ss:$36 sps:$4 sm:$0xff]   ;;  %v1260_v13 = vld [vmem:[#allocation5 + $0x290] ss:$36 sps:$4 sm:$0xff]  }
  0x3a   :  { %v1258_v10 = vld [vmem:[#allocation5 + $0x248] ss:$36 sps:$4 sm:$0xff]   ;;  %v1248_v12 = vld [vmem:[#allocation5 + $0x120] ss:$36 sps:$4 sm:$0xff]   ;;  %v1261_v14 = vld [vmem:[#allocation5 + $0x50] ss:$36 sps:$4 sm:$0xff]  }
  0x3b   :  { %v1259_v11 = vld [vmem:[#allocation5 + $0x8] ss:$36 sps:$4 sm:$0xff]   ;;  %1152 = vmatprep.subr.bf16.mxu1 %v1258_v10  ;;  %v1262_v15 = vld [vmem:[#allocation5 + $0x2d8] ss:$36 sps:$4 sm:$0xff]   ;;  %v1264_v19 = vld [vmem:[#allocation5 + $0x320] ss:$36 sps:$4 sm:$0xff]  }
  0x3c   :  { %155 = vmatpush1.bf16.msra.mxu0 %v1239_v4  ;;  %1153 = vmatpush3.bf16.msra.mxu1 %v1259_v11  ;;  %v1249_v16 = vld [vmem:[#allocation5 + $0x16c] ss:$36 sps:$4 sm:$0xff]   ;;  %v1263_v18 = vld [vmem:[#allocation5 + $0x98] ss:$36 sps:$4 sm:$0xff]   ;;  %v1265_v23 = vld [vmem:[#allocation5 + $0xe0] ss:$36 sps:$4 sm:$0xff]  }
  0x3d   :  { %156 = vmatprep.subr.bf16.mxu0 %v1240_v5  ;;  %1154 = vmatprep.subr.bf16.mxu1 %v1260_v13  ;;  %v1251_v17 = vld [vmem:[#allocation5 + $0x168] ss:$36 sps:$4 sm:$0xff]   ;;  %v1252_v20 = vld [vmem:[#allocation5 + $0x1b4] ss:$36 sps:$4 sm:$0xff]   ;;  %v1255_v22 = vld [vmem:[#allocation5 + $0x1fc] ss:$36 sps:$4 sm:$0xff]  }
  0x3e   :  { %v1254_v21 = vld [vmem:[#allocation5 + $0x1b0] ss:$36 sps:$4 sm:$0xff]   ;;  %v1266_v24 = vld [vmem:[#allocation5 + $0x368] ss:$36 sps:$4 sm:$0xff]   ;;  %v1257_v26 = vld [vmem:[#allocation5 + $0x1f8] ss:$36 sps:$4 sm:$0xff]  }
  0x3f   :  { %v1267_v25 = vld [vmem:[#allocation5 + $0x128] ss:$36 sps:$4 sm:$0xff]   ;;  %v1268_v27 = vld [vmem:[#allocation5 + $0x3b0] ss:$36 sps:$4 sm:$0xff]   ;;  %v53_v29 = vld [vmem:[#allocation2] sm:$0xf] }
  0x40   :  { %157 = vmatpush1.bf16.msra.mxu0 %v1242_v6  ;;  %1155 = vmatpush3.bf16.msra.mxu1 %v1261_v14  ;;  %v1269_v28 = vld [vmem:[#allocation5 + $0x170] ss:$36 sps:$4 sm:$0xff]   ;;  %v1270_v30 = vld [vmem:[#allocation5 + $0x3f8] ss:$36 sps:$4 sm:$0xff]   ;;  %v1272_v32 = vld [vmem:[#allocation5 + $0x440] ss:$36 sps:$4 sm:$0xff]  }
  0x41   :  { %158 = vmatprep.subr.bf16.mxu0 %v1243_v7  ;;  %1156 = vmatprep.subr.bf16.mxu1 %v1262_v15  ;;  %v1271_v31 = vld [vmem:[#allocation5 + $0x1b8] ss:$36 sps:$4 sm:$0xff]   ;;  %v1273_v33 = vld [vmem:[#allocation5 + $0x200] ss:$36 sps:$4 sm:$0xff]   ;;  %v1274_v34 = vld [vmem:[#allocation5 + $0xc] ss:$36 sps:$4 sm:$0xff]  }
  0x42   :  { %v1275_v36 = vld [vmem:[#allocation5 + $0x54] ss:$36 sps:$4 sm:$0xff]   ;;  %v1276_v37 = vld [vmem:[#allocation5 + $0x9c] ss:$36 sps:$4 sm:$0xff]   ;;  %v1277_v38 = vld [vmem:[#allocation5 + $0xe4] ss:$36 sps:$4 sm:$0xff]  }
  0x43   :  { %v1278_v39 = vld [vmem:[#allocation5 + $0x12c] ss:$36 sps:$4 sm:$0xff]   ;;  %v1279_v40 = vld [vmem:[#allocation5 + $0x174] ss:$36 sps:$4 sm:$0xff]   ;;  %v70_v41 = vld [vmem:[#allocation7] sm:$0xff]  ;;  %vm1475_vm0 = vmmov 0  }
  0x44   :  { %159 = vmatpush1.bf16.msra.mxu0 %v1245_v8  ;;  %1157 = vmatpush3.bf16.msra.mxu1 %v1263_v18  ;;  %v71_v42 = vld [vmem:[#allocation7 + $0x8] sm:$0xff]  ;;  %v1280_v53 = vld [vmem:[#allocation5 + $0x1bc] ss:$36 sps:$4 sm:$0xff]   ;;  %v1282_v55 = vld [vmem:[#allocation5 + $0x10] ss:$36 sps:$4 sm:$0xff]   ;;  %s1476_s2 = smov [#allocation8]  }
  0x45   :  { %160 = vmatprep.subr.bf16.mxu0 %v1246_v9  ;;  %1158 = vmatprep.subr.bf16.mxu1 %v1264_v19  ;;  %v1281_v54 = vld [vmem:[#allocation5 + $0x204] ss:$36 sps:$4 sm:$0xff]   ;;  %v1284_v56 = vld [vmem:[#allocation5 + $0x14] ss:$36 sps:$4 sm:$0xff]   ;;  %v1287_v57 = vld [vmem:[#allocation5 + $0x5c] ss:$36 sps:$4 sm:$0xff]  }
  0x46   :  { %v1285_v58 = vld [vmem:[#allocation5 + $0x58] ss:$36 sps:$4 sm:$0xff]   ;;  %v1290_v59 = vld [vmem:[#allocation5 + $0xa4] ss:$36 sps:$4 sm:$0xff]   ;;  %v1293_v61 = vld [vmem:[#allocation5 + $0xec] ss:$36 sps:$4 sm:$0xff]  }
  0x47   :  { %v1288_v60 = vld [vmem:[#allocation5 + $0xa0] ss:$36 sps:$4 sm:$0xff]   ;;  %v1291_v62 = vld [vmem:[#allocation5 + $0xe8] ss:$36 sps:$4 sm:$0xff]   ;;  %v1296_v63 = vld [vmem:[#allocation5 + $0x134] ss:$36 sps:$4 sm:$0xff]  }
  0x48   :  { %161 = vmatpush1.bf16.msra.mxu0 %v1248_v12  ;;  %1159 = vmatpush3.bf16.msra.mxu1 %v1265_v23  ;;  %v1299_v1 = vld [vmem:[#allocation5 + $0x17c] ss:$36 sps:$4 sm:$0xff]   ;;  %v1302_v3 = vld [vmem:[#allocation5 + $0x1c4] ss:$36 sps:$4 sm:$0xff]   ;;  %v229_v6 = vld [vmem:[#allocation7 + $0x10] sm:$0xff]  ;;  %s1038_s21 = sshll.u32 %s1476_s2, 4  ;;  %s1039_s21 = int_to_ptr.vmem [resolvable:$true] %s1038_s21 }
  0x49   :  { %162 = vmatprep.subr.bf16.mxu0 %v1249_v16  ;;  %1160 = vmatprep.subr.bf16.mxu1 %v1266_v24  ;;  %v1297_v2 = vld [vmem:[#allocation5 + $0x178] ss:$36 sps:$4 sm:$0xff]   ;;  %v1300_v4 = vld [vmem:[#allocation5 + $0x1c0] ss:$36 sps:$4 sm:$0xff]   ;;  %v1305_v14 = vld [vmem:[#allocation5 + $0x20c] ss:$36 sps:$4 sm:$0xff]   ;;  %p1445_p11 = scmp.lt.s32.totalorder %s1039_s21, %s1039_s21 }
  0x4a   :  { %v1303_v15 = vld [vmem:[#allocation5 + $0x208] ss:$36 sps:$4 sm:$0xff]   ;;  %v1306_v16 = vld [vmem:[#allocation5 + $0x18] ss:$36 sps:$4 sm:$0xff]   ;;  %v1309_v19 = vld [vmem:[#allocation5 + $0x60] ss:$36 sps:$4 sm:$0xff]  }
  0x4b   :  { %v1311_v18 = vld [vmem:[#allocation5 + $0x64] ss:$36 sps:$4 sm:$0xff]   ;;  %v1315_v23 = vld [vmem:[#allocation5 + $0xf0] ss:$36 sps:$4 sm:$0xff]   ;;  %v1320_v24 = vld [vmem:[#allocation5 + $0x13c] ss:$36 sps:$4 sm:$0xff]  }
  0x4c   :  { %163 = vmatpush1.bf16.msra.mxu0 %v1251_v17  ;;  %1161 = vmatpush3.bf16.msra.mxu1 %v1267_v25  ;;  %v1308_v17 = vld [vmem:[#allocation5 + $0x1c] ss:$36 sps:$4 sm:$0xff]   ;;  %s1440_s22 = scalar_lea.vmem %s1039_s21, 128 }
  0x4d   :  { %164 = vmatprep.subr.bf16.mxu0 %v1252_v20  ;;  %1162 = vmatprep.subr.bf16.mxu1 %v1268_v27  ;;  %v1314_v20 = vld [vmem:[#allocation5 + $0xac] ss:$36 sps:$4 sm:$0xff]   ;;  %v1318_v25 = vld [vmem:[#allocation5 + $0x138] ss:$36 sps:$4 sm:$0xff]   ;;  %v1321_v27 = vld [vmem:[#allocation5 + $0x180] ss:$36 sps:$4 sm:$0xff]   ;;  %p1441_p10 = scmp.ne.s32.totalorder %s1039_s21, %s1440_s22  ;;  %p1446_p12 = scmp.lt.s32.totalorder %s1440_s22, %s1440_s22 }
  0x4f   :  { %p1447_p13 = por %p1446_p12, %p1445_p11 }
  0x50   :  { %165 = vmatpush1.bf16.msra.mxu0 %v1254_v21  ;;  %1163 = vmatpush3.bf16.msra.mxu1 %v1269_v28  ;;  %v1312_v21 = vld [vmem:[#allocation5 + $0xa8] ss:$36 sps:$4 sm:$0xff]  }
  0x51   :  { %166 = vmatprep.subr.bf16.mxu0 %v1255_v22  ;;  %1164 = vmatprep.subr.bf16.mxu1 %v1270_v30  ;;  %v1317_v22 = vld [vmem:[#allocation5 + $0xf4] ss:$36 sps:$4 sm:$0xff]   ;;  %v1326_v28 = vld [vmem:[#allocation5 + $0x1cc] ss:$36 sps:$4 sm:$0xff]   ;;  %p1448_p0 = pnand %p1447_p13, %p1441_p10 }
  0x52   :  { %v1329_v30 = vld [vmem:[#allocation5 + $0x214] ss:$36 sps:$4 sm:$0xff]  }
  0x54   :  { %167 = vmatpush1.bf16.msra.mxu0 %v1257_v26  ;;  %1165 = vmatpush3.bf16.msra.mxu1 %v1271_v31  ;;  %v1323_v26 = vld [vmem:[#allocation5 + $0x184] ss:$36 sps:$4 sm:$0xff]   ;;  %v1327_v31 = vld [vmem:[#allocation5 + $0x210] ss:$36 sps:$4 sm:$0xff]  }
  0x55   :  { %1166 = vmatprep.subr.bf16.mxu1 %v1272_v32  ;;  %1205 = vmatprep.subr.bf16.mxu0 %v1474_v35  ;;  %v1332_v32 = vld [vmem:[#allocation5 + $0x25c] ss:$36 sps:$4 sm:$0xff]  }
  0x57   :  { %185 = vmatmul.mubr.bf16.vlgmr.msra.gmra.mrb[0].mxu0 %v53_v29  ;;  %v1324_v29 = vld [vmem:[#allocation5 + $0x1c8] ss:$36 sps:$4 sm:$0xff]  }
  0x58   :  { %1167 = vmatpush3.bf16.msra.mxu1 %v1273_v33  ;;  %1206 = vmatpush3.bf16.msra.mxu0 %v1274_v34  ;;  %v1330_v33 = vld [vmem:[#allocation5 + $0x258] ss:$36 sps:$4 sm:$0xff]   ;;  %v1335_v34 = vld [vmem:[#allocation5 + $0x2a4] ss:$36 sps:$4 sm:$0xff]  }
  0x59   :  { %1207 = vmatprep.subr.bf16.mxu0 %v1474_v35  ;;  %1221 = vmatprep.mubr.msk.bf16.mxu0 %vm1475_vm0, %v1474_v35 }
  0x5a   :  { %573 = vmatprep.subr.bf16.mxu1 %v1284_v56  ;;  %v1354_v56 = vld [vmem:[#allocation5 + $0x260] ss:$36 sps:$4 sm:$0xff]  }
  0x5c   :  { %1208 = vmatpush3.bf16.msra.mxu0 %v1275_v36  ;;  %v1338_v36 = vld [vmem:[#allocation5 + $0x2ec] ss:$36 sps:$4 sm:$0xff]  }
  0x5d   :  { %1209 = vmatprep.subr.bf16.mxu0 %v1474_v35 }
  0x60   :  { %1210 = vmatpush3.bf16.msra.mxu0 %v1276_v37  ;;  %v1336_v37 = vld [vmem:[#allocation5 + $0x2e8] ss:$36 sps:$4 sm:$0xff]  }
  0x61   :  { %1211 = vmatprep.subr.bf16.mxu0 %v1474_v35 }
  0x64   :  { %1212 = vmatpush3.bf16.msra.mxu0 %v1277_v38  ;;  %v1341_v38 = vld [vmem:[#allocation5 + $0x334] ss:$36 sps:$4 sm:$0xff]  }
  0x65   :  { %1213 = vmatprep.subr.bf16.mxu0 %v1474_v35 }
  0x68   :  { %1214 = vmatpush3.bf16.msra.mxu0 %v1278_v39  ;;  %v1339_v39 = vld [vmem:[#allocation5 + $0x330] ss:$36 sps:$4 sm:$0xff]  }
  0x69   :  { %1215 = vmatprep.subr.bf16.mxu0 %v1474_v35 }
  0x6c   :  { %1216 = vmatpush3.bf16.msra.mxu0 %v1279_v40  ;;  %v1344_v40 = vld [vmem:[#allocation5 + $0x37c] ss:$36 sps:$4 sm:$0xff]  }
  0x6d   :  { %1217 = vmatprep.subr.bf16.mxu0 %v1474_v35 }
  0x70   :  { %1218 = vmatpush3.bf16.msra.mxu0 %v1280_v53  ;;  %v1348_v53 = vld [vmem:[#allocation5 + $0x408] ss:$36 sps:$4 sm:$0xff]  }
  0x71   :  { %1219 = vmatprep.subr.bf16.mxu0 %v1474_v35  ;;  %v1333_v35 = vld [vmem:[#allocation5 + $0x2a0] ss:$36 sps:$4 sm:$0xff]  }
  0x74   :  { %1220 = vmatpush3.bf16.msra.mxu0 %v1281_v54  ;;  %v1353_v54 = vld [vmem:[#allocation5 + $0x454] ss:$36 sps:$4 sm:$0xff]  }
  0x75   :  { %812 = vmatprep.subr.bf16.mxu0 %v1308_v17  ;;  %v1367_v17 = vld [vmem:[#allocation5 + $0x1d0] ss:$36 sps:$4 sm:$0xff]  }
 0x12a   :  { %v186_v43 = vpop.f32.mrb[0].mxu0 }
 0x12b   :  { %v187_v44 = vadd.f32 %v186_v43, %v70_v41  ;;  %v188_v45 = vpop.f32.mrb[1].mxu0  ;;  %v1342_v41 = vld [vmem:[#allocation5 + $0x378] ss:$36 sps:$4 sm:$0xff]   ;;  %v1345_v43 = vld [vmem:[#allocation5 + $0x3c0] ss:$36 sps:$4 sm:$0xff]  }
 0x12c   :  { %v189_v46 = vadd.f32 %v188_v45, %v71_v42  ;;  %v190_v47 = vpop.f32.mrb[2].mxu0  ;;  %v1347_v42 = vld [vmem:[#allocation5 + $0x3c4] ss:$36 sps:$4 sm:$0xff]  }
 0x12d   :  { %v193_v48 = vmax.f32 %v187_v44, 0.0  ;;  %v191_v49 = vpop.f32.mrb[3].mxu0  ;;  %v384_v44 = vld [vmem:[#allocation7 + $0x18] sm:$0xff] }
 0x12e   :  { %v194_v50 = vmax.f32 %v189_v46, 0.0 }
 0x12f   :  { %v195_v52 = vpack.c.bf16 %v193_v48, %v193_v48 }
 0x130   :  { %v196_v51 = vpack.c.bf16 %v194_v50, %v194_v50 }
 0x132   :  { %358 = vmatprep.mubr.bf16.mxu1 %v196_v51 }
 0x133   :  { %359 = vmatmul.mubr.bf16.vlgmr.msra.gmra.mrb[0].mxu1 %v195_v52  ;;  %v1350_v52 = vld [vmem:[#allocation5 + $0x40c] ss:$36 sps:$4 sm:$0xff]  }
 0x134   :  { %605 = vmatprep.mubr.bf16.mxu1 %v1473_v0  ;;  %574 = vmatpush1.bf16.msra.mxu1 %v1282_v55  ;;  %v1294_v0 = vld [vmem:[#allocation5 + $0x130] ss:$36 sps:$4 sm:$0xff]  }
 0x135   :  { %575 = vmatprep.subr.bf16.mxu1 %v1287_v57  ;;  %v1351_v55 = vld [vmem:[#allocation5 + $0x450] ss:$36 sps:$4 sm:$0xff]   ;;  %v1355_v57 = vld [vmem:[#allocation5 + $0x20] ss:$36 sps:$4 sm:$0xff]  }
 0x138   :  { %576 = vmatpush1.bf16.msra.mxu1 %v1285_v58  ;;  %v1356_v58 = vld [vmem:[#allocation5 + $0x2a8] ss:$36 sps:$4 sm:$0xff]  }
 0x139   :  { %577 = vmatprep.subr.bf16.mxu1 %v1290_v59  ;;  %v1357_v59 = vld [vmem:[#allocation5 + $0x68] ss:$36 sps:$4 sm:$0xff]  }
 0x13c   :  { %578 = vmatpush1.bf16.msra.mxu1 %v1288_v60  ;;  %v1358_v60 = vld [vmem:[#allocation5 + $0x2f0] ss:$36 sps:$4 sm:$0xff]  }
 0x13d   :  { %579 = vmatprep.subr.bf16.mxu1 %v1293_v61  ;;  %v1359_v61 = vld [vmem:[#allocation5 + $0xb0] ss:$36 sps:$4 sm:$0xff]  }
 0x140   :  { %580 = vmatpush1.bf16.msra.mxu1 %v1291_v62  ;;  %v1360_v62 = vld [vmem:[#allocation5 + $0x338] ss:$36 sps:$4 sm:$0xff]  }
 0x141   :  { %581 = vmatprep.subr.bf16.mxu1 %v1296_v63  ;;  %v1361_v63 = vld [vmem:[#allocation5 + $0xf8] ss:$36 sps:$4 sm:$0xff]  }
 0x144   :  { %582 = vmatpush1.bf16.msra.mxu1 %v1294_v0  ;;  %v1362_v0 = vld [vmem:[#allocation5 + $0x380] ss:$36 sps:$4 sm:$0xff]  }
 0x145   :  { %583 = vmatprep.subr.bf16.mxu1 %v1299_v1  ;;  %v1363_v1 = vld [vmem:[#allocation5 + $0x140] ss:$36 sps:$4 sm:$0xff]  }
 0x148   :  { %584 = vmatpush1.bf16.msra.mxu1 %v1297_v2  ;;  %v1364_v2 = vld [vmem:[#allocation5 + $0x3c8] ss:$36 sps:$4 sm:$0xff]  }
 0x149   :  { %585 = vmatprep.subr.bf16.mxu1 %v1302_v3  ;;  %v1365_v3 = vld [vmem:[#allocation5 + $0x188] ss:$36 sps:$4 sm:$0xff]  }
 0x14c   :  { %586 = vmatpush1.bf16.msra.mxu1 %v1300_v4  ;;  %v491_v4 = vld [vmem:[#allocation7 + $0x20] sm:$0xff] }
 0x14d   :  { %587 = vmatprep.subr.bf16.mxu1 %v1305_v14 }
 0x150   :  { %588 = vmatpush1.bf16.msra.mxu1 %v1303_v15 }
 0x151   :  { %1183 = vmatprep.subr.bf16.mxu1 %v1354_v56 }
 0x206   :  { %v1168_v5 = vpop.f32.mrb[0].mxu1 }
 0x207   :  { %v1169_v7 = vpop.f32.mrb[1].mxu1 }
 0x208   :  { %v1170_v8 = vadd.f32 %v1169_v7, %v1168_v5  ;;  %v1171_v9 = vpop.f32.mrb[2].mxu1  ;;  %v492_v5 = vld [vmem:[#allocation7 + $0x28] sm:$0xff] }
 0x209   :  { %v1172_v10 = vpop.f32.mrb[3].mxu1 }
 0x20a   :  { %v361_v11 = vadd.f32 %v1170_v8, %v229_v6 }
 0x20c   :  { %v366_v12 = vmax.f32 %v361_v11, 0.0 }
 0x20e   :  { %v367_v13 = vpack.c.bf16 %v366_v12, %v366_v12 }
 0x210   :  { %1222 = vmatmul.mubr.bf16.vlgmr.msra.gmra.mrb[4].mxu0 %v367_v13 }
 0x211   :  { %813 = vmatpush1.bf16.msra.mxu0 %v1306_v16  ;;  %v1366_v16 = vld [vmem:[#allocation5 + $0x410] ss:$36 sps:$4 sm:$0xff]  }
 0x212   :  { %814 = vmatprep.subr.bf16.mxu0 %v1311_v18  ;;  %v1368_v18 = vld [vmem:[#allocation5 + $0x458] ss:$36 sps:$4 sm:$0xff]  }
 0x215   :  { %815 = vmatpush1.bf16.msra.mxu0 %v1309_v19  ;;  %v1369_v19 = vld [vmem:[#allocation5 + $0x218] ss:$36 sps:$4 sm:$0xff]  }
 0x216   :  { %816 = vmatprep.subr.bf16.mxu0 %v1314_v20  ;;  %v650_v20 = vld [vmem:[#allocation7 + $0x30] sm:$0xff] }
 0x219   :  { %817 = vmatpush1.bf16.msra.mxu0 %v1312_v21  ;;  %v651_v21 = vld [vmem:[#allocation7 + $0x38] sm:$0xff] }
 0x21a   :  { %818 = vmatprep.subr.bf16.mxu0 %v1317_v22 }
 0x21d   :  { %819 = vmatpush1.bf16.msra.mxu0 %v1315_v23 }
 0x21e   :  { %820 = vmatprep.subr.bf16.mxu0 %v1320_v24 }
 0x221   :  { %821 = vmatpush1.bf16.msra.mxu0 %v1318_v25 }
 0x222   :  { %822 = vmatprep.subr.bf16.mxu0 %v1323_v26 }
 0x225   :  { %823 = vmatpush1.bf16.msra.mxu0 %v1321_v27 }
 0x226   :  { %824 = vmatprep.subr.bf16.mxu0 %v1326_v28 }
 0x229   :  { %825 = vmatpush1.bf16.msra.mxu0 %v1324_v29 }
 0x22a   :  { %826 = vmatprep.subr.bf16.mxu0 %v1329_v30 }
 0x22d   :  { %827 = vmatpush1.bf16.msra.mxu0 %v1327_v31 }
 0x22e   :  { %828 = vmatprep.subr.bf16.mxu0 %v1332_v32 }
 0x231   :  { %829 = vmatpush1.bf16.msra.mxu0 %v1330_v33  ;;  %v889_v33 = vld [vmem:[#allocation7 + $0x40] sm:$0xff] }
 0x232   :  { %830 = vmatprep.subr.bf16.mxu0 %v1335_v34 }
 0x235   :  { %831 = vmatpush1.bf16.msra.mxu0 %v1333_v35 }
 0x236   :  { %832 = vmatprep.subr.bf16.mxu0 %v1338_v36 }
 0x239   :  { %833 = vmatpush1.bf16.msra.mxu0 %v1336_v37 }
 0x23a   :  { %834 = vmatprep.subr.bf16.mxu0 %v1341_v38 }
 0x23d   :  { %835 = vmatpush1.bf16.msra.mxu0 %v1339_v39 }
 0x23e   :  { %836 = vmatprep.subr.bf16.mxu0 %v1344_v40 }
 0x241   :  { %837 = vmatpush1.bf16.msra.mxu0 %v1342_v41 }
 0x242   :  { %838 = vmatprep.subr.bf16.mxu0 %v1347_v42 }
 0x245   :  { %839 = vmatpush1.bf16.msra.mxu0 %v1345_v43 }
 0x246   :  { %840 = vmatprep.subr.bf16.mxu0 %v1350_v52 }
 0x249   :  { %841 = vmatpush1.bf16.msra.mxu0 %v1348_v53 }
 0x24a   :  { %842 = vmatprep.subr.bf16.mxu0 %v1353_v54 }
 0x24d   :  { %843 = vmatpush1.bf16.msra.mxu0 %v1351_v55 }
 0x2e3   :  { %v467_v45 = vpop.f32.mrb[4].mxu0 }
 0x2e4   :  { %v468_v46 = vadd.f32 %v467_v45, %v384_v44  ;;  %v1223_v47 = vpop.f32.mrb[5].mxu0 }
 0x2e5   :  { %v470_v48 = vpop.f32.mrb[6].mxu0 }
 0x2e6   :  { %v473_v49 = vmax.f32 %v468_v46, 0.0  ;;  %v1224_v50 = vpop.f32.mrb[7].mxu0 }
 0x2e8   :  { %v474_v51 = vpack.c.bf16 %v473_v49, %v473_v49 }
 0x2ea   :  { %606 = vmatmul.mubr.bf16.vlgmr.msra.gmra.mrb[4].mxu1 %v474_v51 }
 0x2eb   :  { %1184 = vmatpush3.bf16.msra.mxu1 %v1355_v57 }
 0x2ec   :  { %1185 = vmatprep.subr.bf16.mxu1 %v1356_v58 }
 0x2ef   :  { %1186 = vmatpush3.bf16.msra.mxu1 %v1357_v59 }
 0x2f0   :  { %1187 = vmatprep.subr.bf16.mxu1 %v1358_v60 }
 0x2f3   :  { %1188 = vmatpush3.bf16.msra.mxu1 %v1359_v61 }
 0x2f4   :  { %1189 = vmatprep.subr.bf16.mxu1 %v1360_v62 }
 0x2f7   :  { %1190 = vmatpush3.bf16.msra.mxu1 %v1361_v63 }
 0x2f8   :  { %1191 = vmatprep.subr.bf16.mxu1 %v1362_v0 }
 0x2fb   :  { %1192 = vmatpush3.bf16.msra.mxu1 %v1363_v1 }
 0x2fc   :  { %1193 = vmatprep.subr.bf16.mxu1 %v1364_v2 }
 0x2ff   :  { %1194 = vmatpush3.bf16.msra.mxu1 %v1365_v3 }
 0x300   :  { %1195 = vmatprep.subr.bf16.mxu1 %v1366_v16 }
 0x303   :  { %1196 = vmatpush3.bf16.msra.mxu1 %v1367_v17 }
 0x304   :  { %1197 = vmatprep.subr.bf16.mxu1 %v1368_v18 }
 0x307   :  { %1198 = vmatpush3.bf16.msra.mxu1 %v1369_v19 }
 0x3bd   :  { %v607_v6 = vpop.f32.mrb[4].mxu1 }
 0x3be   :  { %v608_v7 = vadd.f32 %v607_v6, %v491_v4  ;;  %v609_v8 = vpop.f32.mrb[5].mxu1 }
 0x3bf   :  { %v610_v9 = vadd.f32 %v609_v8, %v492_v5  ;;  %v611_v10 = vpop.f32.mrb[6].mxu1 }
 0x3c0   :  { %v614_v11 = vmax.f32 %v608_v7, 0.0  ;;  %v612_v12 = vpop.f32.mrb[7].mxu1 }
 0x3c1   :  { %v615_v13 = vmax.f32 %v610_v9, 0.0 }
 0x3c2   :  { %v616_v15 = vpack.c.bf16 %v614_v11, %v614_v11 }
 0x3c3   :  { %v617_v14 = vpack.c.bf16 %v615_v13, %v615_v13 }
 0x3c5   :  { %844 = vmatprep.mubr.bf16.mxu0 %v617_v14 }
 0x3c6   :  { %845 = vmatmul.mubr.bf16.vlgmr.msra.gmra.mrb[8].mxu0 %v616_v15 }
 0x499   :  { %v846_v22 = vpop.f32.mrb[8].mxu0 }
 0x49a   :  { %v847_v23 = vadd.f32 %v846_v22, %v650_v20  ;;  %v848_v24 = vpop.f32.mrb[9].mxu0 }
 0x49b   :  { %v849_v25 = vadd.f32 %v848_v24, %v651_v21  ;;  %v850_v26 = vpop.f32.mrb[10].mxu0 }
 0x49c   :  { %v853_v27 = vmax.f32 %v847_v23, 0.0  ;;  %v851_v28 = vpop.f32.mrb[11].mxu0 }
 0x49d   :  { %v854_v29 = vmax.f32 %v849_v25, 0.0 }
 0x49e   :  { %v855_v31 = vpack.c.bf16 %v853_v27, %v853_v27 }
 0x49f   :  { %v856_v30 = vpack.c.bf16 %v854_v29, %v854_v29 }
 0x4a1   :  { %1018 = vmatprep.mubr.bf16.mxu1 %v856_v30 }
 0x4a2   :  { %1019 = vmatmul.mubr.bf16.vlgmr.msra.gmra.mrb[8].mxu1 %v855_v31 }
 0x575   :  { %v1199_v32 = vpop.f32.mrb[8].mxu1 }
 0x576   :  { %v1200_v34 = vpop.f32.mrb[9].mxu1 }
 0x577   :  { %v1201_v35 = vadd.f32 %v1200_v34, %v1199_v32  ;;  %v1202_v36 = vpop.f32.mrb[10].mxu1 }
 0x578   :  { %v1203_v37 = vpop.f32.mrb[11].mxu1 }
 0x579   :  { %v1021_v38 = vadd.f32 %v1201_v35, %v889_v33 }
 0x57b   :  { %v1026_v39 = vsub.f32 0.0, %v1021_v38 }
 0x57d   :  { %v1027_v40 = vmul.f32 1.442695, %v1026_v39 }
 0x57f   :  { %1370 = vpow2.f32 %v1027_v40 }
 0x589   :  { %v1371_v41 = vpop.eup %1370 }
 0x58a   :  { %v1029_v42 = vadd.f32 1.0, %v1371_v41 }
 0x58c   :  { %1372 = vrcp.f32 %v1029_v42 }
 0x596   :  { %v1373_v43 = vpop.eup %1372 }
 0x597   :  { %1031 = vst [vmem:[#allocation8] sm:$0xff] %v1373_v43 }
 0x598   :  { %1451 = shalt.err (!%p1448_p0)
}
 0x599   :  { %s1452_s25 = scalar_lea.hbm %s1550_s3, 128 }
 0x59a   :  { %p1453_p1 = scmp.ne.s32.totalorder %s1550_s3, %s1452_s25  ;;  %p1456_p2 = scmp.lt.u32.totalorder %s1452_s25, %s1550_s3 }
 0x59c   :  { %p1458_p3 = pnand %p1456_p2, %p1453_p1 }
 0x59e   :  { %1461 = shalt.err (!%p1458_p3)
}
 0x59f   :  { %1041 = dma.vmem_to_hbm [thread:$0]  %s1039_s21, 128, %s1550_s3, [#allocation4]  }
 0x5a0   :  { %1466 = dma.done.wait [#allocation4], 128  }
 0x5a1   :  { %1467 = vsyncadd [#allocation4], 4294967168 }
 0x5a2   :  { %1045 = vsyncpa [#allocation3], 1 }
 0x5a3   :  { %1046 = vsyncpa [#allocation6], 1 }
 0x5a4   :  { %1047 = vsyncpa [#allocation4], 1 }

</bundles_post_ra>
